<compile_context>
chip_gen: v7x
topology: tpu7x:2x2x1
jax: 0.10.0
libtpu: 0.0.40
codegen_flags: <defaults>
</compile_context>

<pallas_src>
import functools

import jax
import jax.numpy as jnp
from jax.experimental import pallas as pl
from jax.experimental.pallas import tpu as pltpu

GATE_PAD = 128  # pad the (tiny) num_experts gate axis to a full lane width


def moe_kernel(xq_ref, w_ref, g_ref, out_ref, *, num_experts):
    """Grid = (M_tiles,).  Experts are a statically unrolled in-kernel loop.

    xq_ref : (tm, K)        bf16  fp8-e4m3-quantized activations
    w_ref  : (E, K, N)      bf16  all expert weights (transposed), VMEM-resident
    g_ref  : (tm, GATE_PAD) f32   softmax gate scores (columns >= E are zero)
    out_ref: (tm, N)        f32
    """
    x = xq_ref[...]
    gates = g_ref[...]                       # load once; slice values statically
    acc = jnp.zeros(out_ref.shape, jnp.float32)

    for e in range(num_experts):             # static unroll (E is small)
        # Emulated deep_gemm fp8 x fp8 -> bf16 (rhs_scale == 1): bf16 MXU dot
        # with f32 accumulation, rounded to bf16 like the grouped GEMM output.
        expert_out = jnp.dot(x, w_ref[e],
                             preferred_element_type=jnp.float32)
        expert_out = expert_out.astype(jnp.bfloat16)
        g = gates[:, e:e + 1]                # free static lane slice
        acc = acc + g * expert_out.astype(jnp.float32)

    out_ref[...] = acc                       # single lane-dense store per tile


@functools.partial(jax.jit, static_argnames=("tm_max",))
def moe_forward(x, gate_w, gate_b, expert_w, *, tm_max=256):
    """x: (B, K) f32; gate_w: (E, K); gate_b: (E,); expert_w: (E, N, K)."""
    B, K = x.shape
    E, N, _ = expert_w.shape
    assert E <= GATE_PAD

    # Gate: tiny (B, E) matmul + softmax -- cheaper as plain XLA glue than as
    # an in-kernel one-off f32 MXU pass; softmax stays f32.
    gate_scores = jax.nn.softmax(x @ gate_w.T + gate_b, axis=-1)     # (B, E)

    # Adaptive M tile: multiple of 8, up to tm_max (feeds the full MXU height
    # at real batch sizes without huge padding waste at tiny ones).
    tm = min(tm_max, ((B + 7) // 8) * 8)
    Mp = ((B + tm - 1) // tm) * tm            # mirrors deep_gemm M alignment

    x_pad = x if Mp == B else jnp.zeros((Mp, K), x.dtype).at[:B].set(x)
    g_pad = jnp.zeros((Mp, GATE_PAD), jnp.float32).at[:B, :E].set(gate_scores)

    # fp8 e4m3 quantization (glue).  e4m3 values embed exactly into bf16.
    x_q = x_pad.astype(jnp.float8_e4m3fn).astype(jnp.bfloat16)
    w_q_t = jnp.transpose(
        expert_w.astype(jnp.float8_e4m3fn).astype(jnp.bfloat16), (0, 2, 1))  # (E, K, N)

    kernel = functools.partial(moe_kernel, num_experts=E)

    out = pl.pallas_call(
        kernel,
        out_shape=jax.ShapeDtypeStruct((Mp, N), jnp.float32),
        grid_spec=pltpu.PrefetchScalarGridSpec(
            num_scalar_prefetch=0,
            grid=(Mp // tm,),
            in_specs=[
                pl.BlockSpec((tm, K), lambda m: (m, 0)),           # x quantized
                pl.BlockSpec((E, K, N), lambda m: (0, 0, 0)),      # all expert W
                pl.BlockSpec((tm, GATE_PAD), lambda m: (m, 0)),    # gate scores
            ],
            out_specs=pl.BlockSpec((tm, N), lambda m: (m, 0)),
        ),
        compiler_params=pltpu.CompilerParams(
            dimension_semantics=("parallel",)),
    )(x_q, w_q_t, g_pad)

    return out[:B]


def reference_forward(x, gate_w, gate_b, expert_w):
    """Pure-JAX reference mirroring the PyTorch forward."""
    gate_scores = jax.nn.softmax(x @ gate_w.T + gate_b, axis=-1)        # (B, E)
    x_q = x.astype(jnp.float8_e4m3fn).astype(jnp.float32)
    w_q = expert_w.astype(jnp.float8_e4m3fn).astype(jnp.float32)
    per_expert = jnp.einsum("mk,enk->emn", x_q, w_q).astype(jnp.bfloat16)
    out = (gate_scores.T[:, :, None] * per_expert.astype(jnp.float32)).sum(0)
    return out


if __name__ == "__main__":
    # Small shapes consistent with the module's forward.
    batch, input_dim, hidden_dim, num_experts = 32, 128, 256, 4

    key = jax.random.PRNGKey(0)
    k_x, k_gw, k_gb, k_ew = jax.random.split(key, 4)

    x = jax.random.normal(k_x, (batch, input_dim), jnp.float32)

    # Deterministic nn.Linear-style init: U(-1/sqrt(fan_in), 1/sqrt(fan_in)).
    bound = 1.0 / (input_dim ** 0.5)
    gate_w = jax.random.uniform(k_gw, (num_experts, input_dim), jnp.float32,
                                -bound, bound)
    gate_b = jax.random.uniform(k_gb, (num_experts,), jnp.float32, -bound, bound)
    expert_w = jax.random.uniform(k_ew, (num_experts, hidden_dim, input_dim),
                                  jnp.float32, -bound, bound)
    # TODO(synk): expert biases exist in the PyTorch module but are never used
    # by its deep_gemm forward path, so they are intentionally omitted here.

    out = moe_forward(x, gate_w, gate_b, expert_w)
    out = jax.block_until_ready(out)

    ref = reference_forward(x, gate_w, gate_b, expert_w)
    assert out.shape == (batch, hidden_dim)
    assert jnp.allclose(out, ref, rtol=2e-2, atol=2e-2), (
        float(jnp.max(jnp.abs(out - ref))))

    print("KERNEL_OK")
</pallas_src>

<mosaic_0001>
module attributes {stable_mosaic.version = 11 : i64} {
  func.func @moe_kernel(%arg0: i32, %arg1: memref<32x128xbf16, #tpu.memory_space<vmem>>, %arg2: memref<4x128x256xbf16, #tpu.memory_space<vmem>>, %arg3: memref<32x128xf32, #tpu.memory_space<vmem>>, %arg4: memref<32x256xf32, #tpu.memory_space<vmem>>) attributes {dimension_semantics = [#tpu.dimension_semantics<parallel>], iteration_bounds = array<i64: 1>, scalar_prefetch = 0 : i64, scratch_operands = 0 : i64, tpu.core_type = #tpu.core_type<tc>, window_params = [{transform_indices = @transform_0, window_bounds = array<i64: 32, 128>}, {pipeline_mode = #tpu.pipeline_mode<synchronous>, transform_indices = @transform_1, window_bounds = array<i64: 4, 128, 256>}, {transform_indices = @transform_2, window_bounds = array<i64: 32, 128>}, {transform_indices = @transform_3, window_bounds = array<i64: 32, 256>}]} {
    %c0 = arith.constant 0 : index
    %c0_0 = arith.constant 0 : index
    %0 = vector.load %arg1[%c0, %c0_0] : memref<32x128xbf16, #tpu.memory_space<vmem>>, vector<32x128xbf16>
    %c0_1 = arith.constant 0 : index
    %c0_2 = arith.constant 0 : index
    %1 = vector.load %arg3[%c0_1, %c0_2] : memref<32x128xf32, #tpu.memory_space<vmem>>, vector<32x128xf32>
    %cst = arith.constant 0.000000e+00 : f32
    %2 = vector.broadcast %cst : f32 to vector<32x256xf32>
    %c0_3 = arith.constant 0 : index
    %c0_4 = arith.constant 0 : index
    %c0_5 = arith.constant 0 : index
    %3 = vector.load %arg2[%c0_3, %c0_4, %c0_5] : memref<4x128x256xbf16, #tpu.memory_space<vmem>>, vector<1x128x256xbf16>
    %4 = vector.shape_cast %3 : vector<1x128x256xbf16> to vector<128x256xbf16>
    %cst_6 = arith.constant dense<0.000000e+00> : vector<32x256xf32>
    %5 = tpu.matmul %0, %4, %cst_6 {dimension_numbers = #tpu.dot_dimension_numbers<[1], [0], [0], [1], [0, 0, 1, 1], [], []>} : vector<32x128xbf16>, vector<128x256xbf16>, vector<32x256xf32> -> vector<32x256xf32>
    %6 = arith.truncf %5 : vector<32x256xf32> to vector<32x256xbf16>
    %7 = vector.extract_strided_slice %1 {offsets = [0, 0], sizes = [32, 1], strides = [1, 1]} : vector<32x128xf32> to vector<32x1xf32>
    %8 = arith.extf %6 : vector<32x256xbf16> to vector<32x256xf32>
    %9 = vector.broadcast %7 : vector<32x1xf32> to vector<32x256xf32>
    %10 = arith.mulf %9, %8 : vector<32x256xf32>
    %11 = arith.addf %2, %10 : vector<32x256xf32>
    %c1 = arith.constant 1 : index
    %c0_7 = arith.constant 0 : index
    %c0_8 = arith.constant 0 : index
    %12 = vector.load %arg2[%c1, %c0_7, %c0_8] : memref<4x128x256xbf16, #tpu.memory_space<vmem>>, vector<1x128x256xbf16>
    %13 = vector.shape_cast %12 : vector<1x128x256xbf16> to vector<128x256xbf16>
    %cst_9 = arith.constant dense<0.000000e+00> : vector<32x256xf32>
    %14 = tpu.matmul %0, %13, %cst_9 {dimension_numbers = #tpu.dot_dimension_numbers<[1], [0], [0], [1], [0, 0, 1, 1], [], []>} : vector<32x128xbf16>, vector<128x256xbf16>, vector<32x256xf32> -> vector<32x256xf32>
    %15 = arith.truncf %14 : vector<32x256xf32> to vector<32x256xbf16>
    %16 = vector.extract_strided_slice %1 {offsets = [0, 1], sizes = [32, 1], strides = [1, 1]} : vector<32x128xf32> to vector<32x1xf32>
    %17 = arith.extf %15 : vector<32x256xbf16> to vector<32x256xf32>
    %18 = vector.broadcast %16 : vector<32x1xf32> to vector<32x256xf32>
    %19 = arith.mulf %18, %17 : vector<32x256xf32>
    %20 = arith.addf %11, %19 : vector<32x256xf32>
    %c2 = arith.constant 2 : index
    %c0_10 = arith.constant 0 : index
    %c0_11 = arith.constant 0 : index
    %21 = vector.load %arg2[%c2, %c0_10, %c0_11] : memref<4x128x256xbf16, #tpu.memory_space<vmem>>, vector<1x128x256xbf16>
    %22 = vector.shape_cast %21 : vector<1x128x256xbf16> to vector<128x256xbf16>
    %cst_12 = arith.constant dense<0.000000e+00> : vector<32x256xf32>
    %23 = tpu.matmul %0, %22, %cst_12 {dimension_numbers = #tpu.dot_dimension_numbers<[1], [0], [0], [1], [0, 0, 1, 1], [], []>} : vector<32x128xbf16>, vector<128x256xbf16>, vector<32x256xf32> -> vector<32x256xf32>
    %24 = arith.truncf %23 : vector<32x256xf32> to vector<32x256xbf16>
    %25 = vector.extract_strided_slice %1 {offsets = [0, 2], sizes = [32, 1], strides = [1, 1]} : vector<32x128xf32> to vector<32x1xf32>
    %26 = arith.extf %24 : vector<32x256xbf16> to vector<32x256xf32>
    %27 = vector.broadcast %25 : vector<32x1xf32> to vector<32x256xf32>
    %28 = arith.mulf %27, %26 : vector<32x256xf32>
    %29 = arith.addf %20, %28 : vector<32x256xf32>
    %c3 = arith.constant 3 : index
    %c0_13 = arith.constant 0 : index
    %c0_14 = arith.constant 0 : index
    %30 = vector.load %arg2[%c3, %c0_13, %c0_14] : memref<4x128x256xbf16, #tpu.memory_space<vmem>>, vector<1x128x256xbf16>
    %31 = vector.shape_cast %30 : vector<1x128x256xbf16> to vector<128x256xbf16>
    %cst_15 = arith.constant dense<0.000000e+00> : vector<32x256xf32>
    %32 = tpu.matmul %0, %31, %cst_15 {dimension_numbers = #tpu.dot_dimension_numbers<[1], [0], [0], [1], [0, 0, 1, 1], [], []>} : vector<32x128xbf16>, vector<128x256xbf16>, vector<32x256xf32> -> vector<32x256xf32>
    %33 = arith.truncf %32 : vector<32x256xf32> to vector<32x256xbf16>
    %34 = vector.extract_strided_slice %1 {offsets = [0, 3], sizes = [32, 1], strides = [1, 1]} : vector<32x128xf32> to vector<32x1xf32>
    %35 = arith.extf %33 : vector<32x256xbf16> to vector<32x256xf32>
    %36 = vector.broadcast %34 : vector<32x1xf32> to vector<32x256xf32>
    %37 = arith.mulf %36, %35 : vector<32x256xf32>
    %38 = arith.addf %29, %37 : vector<32x256xf32>
    %c0_16 = arith.constant 0 : index
    %c0_17 = arith.constant 0 : index
    %39 = vector.load %arg4[%c0_16, %c0_17] : memref<32x256xf32, #tpu.memory_space<vmem>>, vector<32x256xf32>
    tpu.vector_store %arg4[%c0_16, %c0_17], %38 {strides = array<i32>} : memref<32x256xf32, #tpu.memory_space<vmem>>, vector<32x256xf32>,
    return
  }
  func.func @transform_0(%arg0: i32) -> (i32, i32) {
    %c0_i32 = arith.constant 0 : i32
    %c0_i32_0 = arith.constant 0 : i32
    return %arg0, %c0_i32 : i32, i32
  }
  func.func @transform_1(%arg0: i32) -> (i32, i32, i32) {
    %c0_i32 = arith.constant 0 : i32
    %c0_i32_0 = arith.constant 0 : i32
    %c0_i32_1 = arith.constant 0 : i32
    %c0_i32_2 = arith.constant 0 : i32
    return %c0_i32, %c0_i32_0, %c0_i32_1 : i32, i32, i32
  }
  func.func @transform_2(%arg0: i32) -> (i32, i32) {
    %c0_i32 = arith.constant 0 : i32
    %c0_i32_0 = arith.constant 0 : i32
    return %arg0, %c0_i32 : i32, i32
  }
  func.func @transform_3(%arg0: i32) -> (i32, i32) {
    %c0_i32 = arith.constant 0 : i32
    %c0_i32_0 = arith.constant 0 : i32
    return %arg0, %c0_i32 : i32, i32
  }
}

</mosaic_0001>

<bundles_post_ra>
// kernel: moe_forward.1
= control target key start
LH: loop header
LB: loop body
LE: loop exit
PB: predicated region body
PF: predicated region fallthrough
CT: control target
= control target key end

     0   :  { %v1090_v2 = vmov 0   ;;  %s1407_s0 = inlined_call_operand.vmem [shape: bf16[32,128], index: 0, kind: input, shape index: {}]   ;;  %s1408_s1 = inlined_call_operand.vmem [shape: bf16[4,128,256], index: 1, kind: input, shape index: {}]   ;;  %s1409_s2 = inlined_call_operand.vmem [shape: f32[32,128], index: 2, kind: input, shape index: {}]   ;;  %s1410_s3 = inlined_call_operand.hbm [shape: f32[32,256], index: 3, kind: output, shape index: {}]  }
   0x1   :  { %v968_v0 = vld [vmem:[%s1408_s1 + $0x4] ss:$8 sps:$4 sm:$0xff]   ;;  %164 = vmatprep.mubr.bf16.mxu0 %v1090_v2  ;;  %362 = vmatprep.mubr.bf16.mxu1 %v1090_v2  ;;  %v972_v3 = vld [vmem:[%s1408_s1] ss:$8 sps:$4 sm:$0xff]   ;;  %v974_v5 = vld [vmem:[%s1408_s1 + $0x14] ss:$8 sps:$4 sm:$0xff]  }
   0x2   :  { %v970_v1 = vld [vmem:[%s1408_s1 + $0x84] ss:$8 sps:$4 sm:$0xff]   ;;  %132 = vmatprep.subr.bf16.mxu0 %v968_v0  ;;  %v973_v4 = vld [vmem:[%s1408_s1 + $0x80] ss:$8 sps:$4 sm:$0xff]   ;;  %961 = vset.pattern.permute.xlu1 %v1090_v2  ;;  %v976_v6 = vld [vmem:[%s1408_s1 + $0x94] ss:$8 sps:$4 sm:$0xff]  }
   0x3   :  { %330 = vmatprep.subr.bf16.mxu1 %v970_v1  ;;  %960 = vset.pattern.permute.xlu0 %v1090_v2  ;;  %v978_v7 = vld [vmem:[%s1408_s1 + $0x10] ss:$8 sps:$4 sm:$0xff]   ;;  %v980_v9 = vld [vmem:[%s1408_s1 + $0x24] ss:$8 sps:$4 sm:$0xff]   ;;  %v984_v11 = vld [vmem:[%s1408_s1 + $0x20] ss:$8 sps:$4 sm:$0xff]  }
   0x4   :  { %133 = vmatpush1.bf16.msra.mxu0 %v972_v3  ;;  %331 = vmatpush1.bf16.msra.mxu1 %v973_v4  ;;  %v979_v8 = vld [vmem:[%s1408_s1 + $0x90] ss:$8 sps:$4 sm:$0xff]   ;;  %v982_v10 = vld [vmem:[%s1408_s1 + $0xa4] ss:$8 sps:$4 sm:$0xff]   ;;  %v985_v12 = vld [vmem:[%s1408_s1 + $0xa0] ss:$8 sps:$4 sm:$0xff]  }
   0x5   :  { %134 = vmatprep.subr.bf16.mxu0 %v974_v5  ;;  %332 = vmatprep.subr.bf16.mxu1 %v976_v6  ;;  %v986_v13 = vld [vmem:[%s1408_s1 + $0x34] ss:$8 sps:$4 sm:$0xff]   ;;  %v990_v15 = vld [vmem:[%s1408_s1 + $0x30] ss:$8 sps:$4 sm:$0xff]   ;;  %v992_v17 = vld [vmem:[%s1408_s1 + $0x44] ss:$8 sps:$4 sm:$0xff]  }
   0x6   :  { %v988_v14 = vld [vmem:[%s1408_s1 + $0xb4] ss:$8 sps:$4 sm:$0xff]   ;;  %v991_v16 = vld [vmem:[%s1408_s1 + $0xb0] ss:$8 sps:$4 sm:$0xff]   ;;  %v994_v18 = vld [vmem:[%s1408_s1 + $0xc4] ss:$8 sps:$4 sm:$0xff]  }
   0x7   :  { %v996_v19 = vld [vmem:[%s1408_s1 + $0x40] ss:$8 sps:$4 sm:$0xff]   ;;  %v998_v21 = vld [vmem:[%s1408_s1 + $0x54] ss:$8 sps:$4 sm:$0xff]   ;;  %v1002_v23 = vld [vmem:[%s1408_s1 + $0x50] ss:$8 sps:$4 sm:$0xff]  }
   0x8   :  { %135 = vmatpush1.bf16.msra.mxu0 %v978_v7  ;;  %333 = vmatpush1.bf16.msra.mxu1 %v979_v8  ;;  %v997_v20 = vld [vmem:[%s1408_s1 + $0xc0] ss:$8 sps:$4 sm:$0xff]   ;;  %v1000_v22 = vld [vmem:[%s1408_s1 + $0xd4] ss:$8 sps:$4 sm:$0xff]   ;;  %v1003_v24 = vld [vmem:[%s1408_s1 + $0xd0] ss:$8 sps:$4 sm:$0xff]  }
   0x9   :  { %136 = vmatprep.subr.bf16.mxu0 %v980_v9  ;;  %334 = vmatprep.subr.bf16.mxu1 %v982_v10  ;;  %v1004_v25 = vld [vmem:[%s1408_s1 + $0x64] ss:$8 sps:$4 sm:$0xff]   ;;  %v1008_v27 = vld [vmem:[%s1408_s1 + $0x60] ss:$8 sps:$4 sm:$0xff]   ;;  %v1010_v29 = vld [vmem:[%s1408_s1 + $0x74] ss:$8 sps:$4 sm:$0xff]  }
   0xa   :  { %v1006_v26 = vld [vmem:[%s1408_s1 + $0xe4] ss:$8 sps:$4 sm:$0xff]   ;;  %v1009_v28 = vld [vmem:[%s1408_s1 + $0xe0] ss:$8 sps:$4 sm:$0xff]   ;;  %v1012_v30 = vld [vmem:[%s1408_s1 + $0xf4] ss:$8 sps:$4 sm:$0xff]  }
   0xb   :  { %v1014_v31 = vld [vmem:[%s1408_s1 + $0x70] ss:$8 sps:$4 sm:$0xff]   ;;  %v1019_v33 = vld [vmem:[%s1408_s1 + $0x104] ss:$8 sps:$4 sm:$0xff]   ;;  %v1017_v36 = vld [vmem:[%s1408_s1 + $0x100] ss:$8 sps:$4 sm:$0xff]  }
   0xc   :  { %137 = vmatpush1.bf16.msra.mxu0 %v984_v11  ;;  %335 = vmatpush1.bf16.msra.mxu1 %v985_v12  ;;  %v1015_v32 = vld [vmem:[%s1408_s1 + $0xf0] ss:$8 sps:$4 sm:$0xff]   ;;  %v1022_v34 = vld [vmem:[%s1408_s1 + $0x184] ss:$8 sps:$4 sm:$0xff]   ;;  %v1020_v37 = vld [vmem:[%s1408_s1 + $0x180] ss:$8 sps:$4 sm:$0xff]  }
   0xd   :  { %138 = vmatprep.subr.bf16.mxu0 %v986_v13  ;;  %336 = vmatprep.subr.bf16.mxu1 %v988_v14  ;;  %v1226_v35 = vld [vmem:[%s1407_s0] sm:$0xff]   ;;  %v1025_v38 = vld [vmem:[%s1408_s1 + $0x114] ss:$8 sps:$4 sm:$0xff]   ;;  %v1023_v40 = vld [vmem:[%s1408_s1 + $0x110] ss:$8 sps:$4 sm:$0xff]  }
   0xe   :  { %v1028_v39 = vld [vmem:[%s1408_s1 + $0x194] ss:$8 sps:$4 sm:$0xff]   ;;  %v1026_v41 = vld [vmem:[%s1408_s1 + $0x190] ss:$8 sps:$4 sm:$0xff]   ;;  %v1032_v42 = vld [vmem:[%s1408_s1 + $0x124] ss:$8 sps:$4 sm:$0xff]  }
   0xf   :  { %v1035_v43 = vld [vmem:[%s1408_s1 + $0x1a4] ss:$8 sps:$4 sm:$0xff]   ;;  %v1030_v45 = vld [vmem:[%s1408_s1 + $0x120] ss:$8 sps:$4 sm:$0xff]   ;;  %v1038_v47 = vld [vmem:[%s1408_s1 + $0x134] ss:$8 sps:$4 sm:$0xff]  }
  0x10   :  { %139 = vmatpush1.bf16.msra.mxu0 %v990_v15  ;;  %337 = vmatpush1.bf16.msra.mxu1 %v991_v16  ;;  %v1259_v44 = vld [vmem:[%s1407_s0 + $0x8] sm:$0xff]   ;;  %v1041_v48 = vld [vmem:[%s1408_s1 + $0x1b4] ss:$8 sps:$4 sm:$0xff]   ;;  %v1036_v49 = vld [vmem:[%s1408_s1 + $0x130] ss:$8 sps:$4 sm:$0xff]  }
  0x11   :  { %140 = vmatprep.subr.bf16.mxu0 %v992_v17  ;;  %338 = vmatprep.subr.bf16.mxu1 %v994_v18  ;;  %v1033_v46 = vld [vmem:[%s1408_s1 + $0x1a0] ss:$8 sps:$4 sm:$0xff]   ;;  %v1039_v50 = vld [vmem:[%s1408_s1 + $0x1b0] ss:$8 sps:$4 sm:$0xff]   ;;  %v1044_v52 = vld [vmem:[%s1408_s1 + $0x144] ss:$8 sps:$4 sm:$0xff]  }
  0x12   :  { %v1284_v51 = vld [vmem:[%s1409_s2 + $0x10] sm:$0xff]  ;;  %v1047_v53 = vld [vmem:[%s1408_s1 + $0x1c4] ss:$8 sps:$4 sm:$0xff]  }
  0x13   :  { %v20_v54 = vld [vmem:[%s1409_s2] sm:$0xff] }
  0x14   :  { %141 = vmatpush1.bf16.msra.mxu0 %v996_v19  ;;  %339 = vmatpush1.bf16.msra.mxu1 %v997_v20 }
  0x15   :  { %142 = vmatprep.subr.bf16.mxu0 %v998_v21  ;;  %340 = vmatprep.subr.bf16.mxu1 %v1000_v22 }
  0x18   :  { %143 = vmatpush1.bf16.msra.mxu0 %v1002_v23  ;;  %341 = vmatpush1.bf16.msra.mxu1 %v1003_v24 }
  0x19   :  { %144 = vmatprep.subr.bf16.mxu0 %v1004_v25  ;;  %342 = vmatprep.subr.bf16.mxu1 %v1006_v26 }
  0x1c   :  { %145 = vmatpush1.bf16.msra.mxu0 %v1008_v27  ;;  %343 = vmatpush1.bf16.msra.mxu1 %v1009_v28 }
  0x1d   :  { %146 = vmatprep.subr.bf16.mxu0 %v1010_v29  ;;  %344 = vmatprep.subr.bf16.mxu1 %v1012_v30 }
  0x20   :  { %147 = vmatpush1.bf16.msra.mxu0 %v1014_v31  ;;  %345 = vmatpush1.bf16.msra.mxu1 %v1015_v32 }
  0x21   :  { %524 = vmatprep.subr.bf16.mxu0 %v1019_v33  ;;  %718 = vmatprep.subr.bf16.mxu1 %v1022_v34 }
  0x23   :  { %165 = vmatmul.mubr.bf16.vlgmr.msra.gmra.mrb[0].mxu0 %v1226_v35  ;;  %363 = vmatmul.mubr.bf16.vlgmr.msra.gmra.mrb[0].mxu1 %v1226_v35 }
  0x24   :  { %525 = vmatpush1.bf16.msra.mxu0 %v1017_v36  ;;  %719 = vmatpush1.bf16.msra.mxu1 %v1020_v37 }
  0x25   :  { %526 = vmatprep.subr.bf16.mxu0 %v1025_v38  ;;  %720 = vmatprep.subr.bf16.mxu1 %v1028_v39 }
  0x26   :  { %174 = vmatprep.mubr.bf16.mxu0 %v1090_v2  ;;  %372 = vmatprep.mubr.bf16.mxu1 %v1090_v2 }
  0x28   :  { %527 = vmatpush1.bf16.msra.mxu0 %v1023_v40  ;;  %721 = vmatpush1.bf16.msra.mxu1 %v1026_v41 }
  0x29   :  { %528 = vmatprep.subr.bf16.mxu0 %v1032_v42  ;;  %722 = vmatprep.subr.bf16.mxu1 %v1035_v43 }
  0x2b   :  { %175 = vmatmul.mubr.bf16.gmra.mrb[4].mxu0 %v1259_v44  ;;  %373 = vmatmul.mubr.bf16.gmra.mrb[4].mxu1 %v1259_v44 }
  0x2c   :  { %529 = vmatpush1.bf16.msra.mxu0 %v1030_v45  ;;  %723 = vmatpush1.bf16.msra.mxu1 %v1033_v46 }
  0x2d   :  { %530 = vmatprep.subr.bf16.mxu0 %v1038_v47  ;;  %724 = vmatprep.subr.bf16.mxu1 %v1041_v48 }
  0x2e   :  { %556 = vmatprep.mubr.bf16.mxu0 %v1090_v2  ;;  %750 = vmatprep.mubr.bf16.mxu1 %v1090_v2 }
  0x2f   :  { %8 = vsyncpa [#allocation3], 0  ;;  %v1042_v55 = vld [vmem:[%s1408_s1 + $0x140] ss:$8 sps:$4 sm:$0xff]   ;;  %209 = vperm.xlu1 %961, %v1284_v51   ;;  %199 = vperm.xlu0 %960, %v20_v54   ;;  %v23_v57 = vld [vmem:[%s1409_s2 + $0x18] sm:$0xff]  ;;  %v1091_v1 = vmov 1  }
  0x30   :  { %531 = vmatpush1.bf16.msra.mxu0 %v1036_v49  ;;  %725 = vmatpush1.bf16.msra.mxu1 %v1039_v50  ;;  %v1045_v56 = vld [vmem:[%s1408_s1 + $0x1c0] ss:$8 sps:$4 sm:$0xff]   ;;  %v1050_v59 = vld [vmem:[%s1408_s1 + $0x154] ss:$8 sps:$4 sm:$0xff]   ;;  %v1048_v61 = vld [vmem:[%s1408_s1 + $0x150] ss:$8 sps:$4 sm:$0xff]  }
  0x31   :  { %v21_v58 = vld [vmem:[%s1409_s2 + $0x8] sm:$0xff]  ;;  %532 = vmatprep.subr.bf16.mxu0 %v1044_v52  ;;  %726 = vmatprep.subr.bf16.mxu1 %v1047_v53  ;;  %v1053_v60 = vld [vmem:[%s1408_s1 + $0x1d4] ss:$8 sps:$4 sm:$0xff]   ;;  %v1051_v62 = vld [vmem:[%s1408_s1 + $0x1d0] ss:$8 sps:$4 sm:$0xff]   ;;  %v1092_v9 = vmov 2  }
  0x32   :  { %v1056_v63 = vld [vmem:[%s1408_s1 + $0x164] ss:$8 sps:$4 sm:$0xff]   ;;  %v1054_v3 = vld [vmem:[%s1408_s1 + $0x160] ss:$8 sps:$4 sm:$0xff]   ;;  %v1062_v5 = vld [vmem:[%s1408_s1 + $0x174] ss:$8 sps:$4 sm:$0xff]  }
  0x33   :  { %214 = vperm.xlu1 %961, %v23_v57   ;;  %204 = vperm.xlu0 %960, %v21_v58   ;;  %v1059_v0 = vld [vmem:[%s1408_s1 + $0x1e4] ss:$8 sps:$4 sm:$0xff]   ;;  %v1057_v4 = vld [vmem:[%s1408_s1 + $0x1e0] ss:$8 sps:$4 sm:$0xff]   ;;  %v1065_v6 = vld [vmem:[%s1408_s1 + $0x1f4] ss:$8 sps:$4 sm:$0xff]  }
  0x34   :  { %533 = vmatpush1.bf16.msra.mxu0 %v1042_v55  ;;  %727 = vmatpush1.bf16.msra.mxu1 %v1045_v56  ;;  %v1060_v7 = vld [vmem:[%s1408_s1 + $0x170] ss:$8 sps:$4 sm:$0xff]   ;;  %v1093_v10 = vmov 3  }
  0x35   :  { %534 = vmatprep.subr.bf16.mxu0 %v1050_v59  ;;  %728 = vmatprep.subr.bf16.mxu1 %v1053_v60  ;;  %v1063_v8 = vld [vmem:[%s1408_s1 + $0x1f0] ss:$8 sps:$4 sm:$0xff]   ;;  %s1094_s1 = smov [#allocation2]  }
  0x36   :  { %s828_s14 = sshll.u32 %s1094_s1, 4  ;;  %s829_s14 = int_to_ptr.vmem [resolvable:$true] %s828_s14 }
  0x37   :  { %963 = vset.pattern.permute.xlu1 %v1091_v1  ;;  %962 = vset.pattern.permute.xlu0 %v1091_v1  ;;  %s1066_s15 = scalar_lea.vmem %s829_s14, 1024  ;;  %p1071_p1 = scmp.lt.s32.totalorder %s829_s14, %s829_s14 }
  0x38   :  { %535 = vmatpush1.bf16.msra.mxu0 %v1048_v61  ;;  %729 = vmatpush1.bf16.msra.mxu1 %v1051_v62  ;;  %p1067_p0 = scmp.ne.s32.totalorder %s829_s14, %s1066_s15  ;;  %p1072_p2 = scmp.lt.s32.totalorder %s1066_s15, %s1066_s15 }
  0x39   :  { %536 = vmatprep.subr.bf16.mxu0 %v1056_v63  ;;  %730 = vmatprep.subr.bf16.mxu1 %v1059_v0 }
  0x3a   :  { %400 = vperm.xlu1 %963, %v21_v58   ;;  %396 = vperm.xlu0 %962, %v20_v54   ;;  %p1073_p3 = por %p1072_p2, %p1071_p1 }
  0x3c   :  { %537 = vmatpush1.bf16.msra.mxu0 %v1054_v3  ;;  %731 = vmatpush1.bf16.msra.mxu1 %v1057_v4  ;;  %p1074_p4 = pnand %p1073_p3, %p1067_p0 }
  0x3d   :  { %538 = vmatprep.subr.bf16.mxu0 %v1062_v5  ;;  %732 = vmatprep.subr.bf16.mxu1 %v1065_v6 }
  0x3e   :  { %404 = vperm.xlu1 %963, %v1284_v51   ;;  %408 = vperm.xlu0 %962, %v23_v57  }
  0x40   :  { %539 = vmatpush1.bf16.msra.mxu0 %v1060_v7  ;;  %733 = vmatpush1.bf16.msra.mxu1 %v1063_v8 }
  0x42   :  { %964 = vset.pattern.permute.xlu1 %v1092_v9  ;;  %965 = vset.pattern.permute.xlu0 %v1092_v9 }
  0x43   :  { %557 = vmatmul.mubr.bf16.vlgmr.msra.gmra.mrb[8].mxu0 %v1226_v35  ;;  %751 = vmatmul.mubr.bf16.vlgmr.msra.gmra.mrb[8].mxu1 %v1226_v35 }
  0x44   :  { %566 = vmatprep.mubr.bf16.mxu0 %v1090_v2  ;;  %760 = vmatprep.mubr.bf16.mxu1 %v1090_v2 }
  0x45   :  { %590 = vperm.xlu1 %964, %v20_v54   ;;  %594 = vperm.xlu0 %965, %v21_v58  }
  0x49   :  { %598 = vperm.xlu1 %964, %v1284_v51   ;;  %966 = vset.pattern.permute.xlu0 %v1093_v10 }
  0x4a   :  { %784 = vperm.xlu0 %966, %v20_v54  }
  0x4b   :  { %567 = vmatmul.mubr.bf16.gmra.mrb[12].mxu0 %v1259_v44  ;;  %761 = vmatmul.mubr.bf16.gmra.mrb[12].mxu1 %v1259_v44 }
  0x4d   :  { %602 = vperm.xlu1 %964, %v23_v57  }
  0x4e   :  { %796 = vperm.xlu0 %966, %v23_v57  }
  0x51   :  { %967 = vset.pattern.permute.xlu1 %v1093_v10 }
  0x52   :  { %788 = vperm.xlu1 %967, %v21_v58  }
  0x56   :  { %792 = vperm.xlu1 %967, %v1284_v51  }
  0xae   :  { %v1355_v11 = vpop.permute.xlu1 %209  ;;  %v200_v2 = vpop.permute.xlu0 %199 }
  0xb2   :  { %v1357_v12 = vpop.permute.xlu1 %214  ;;  %v205_v13 = vpop.permute.xlu0 %204 }
  0xb9   :  { %v401_v26 = vpop.permute.xlu1 %400  ;;  %v397_v27 = vpop.permute.xlu0 %396 }
  0xbd   :  { %v405_v60 = vpop.permute.xlu1 %404  ;;  %v409_v61 = vpop.permute.xlu0 %408 }
  0xf6   :  { %v166_v14 = vpop.f32.mrb[0].mxu0  ;;  %v364_v15 = vpop.f32.mrb[0].mxu1 }
  0xf7   :  { %v168_v16 = vpop.f32.mrb[1].mxu0  ;;  %v366_v17 = vpop.f32.mrb[1].mxu1 }
  0xf8   :  { %v170_v18 = vpop.f32.mrb[2].mxu0  ;;  %v368_v19 = vpop.f32.mrb[2].mxu1 }
  0xf9   :  { %v185_v20 = vpack.c.bf16 %v170_v18, %v166_v14  ;;  %v383_v21 = vpack.c.bf16 %v368_v19, %v364_v15  ;;  %v172_v22 = vpop.f32.mrb[3].mxu0  ;;  %v370_v23 = vpop.f32.mrb[3].mxu1 }
  0xfa   :  { %v186_v24 = vpack.c.bf16 %v172_v22, %v168_v16  ;;  %v384_v25 = vpack.c.bf16 %v370_v23, %v366_v17  ;;  %v595_v23 = vpop.permute.xlu0 %594 }
  0xfb   :  { %v189_v28 = vunpack.c.l.bf16 %v185_v20  ;;  %v191_v29 = vunpack.c.h.bf16 %v185_v20  ;;  %v387_v30 = vunpack.c.l.bf16 %v383_v21  ;;  %v389_v31 = vunpack.c.h.bf16 %v383_v21  ;;  %v591_v20 = vpop.permute.xlu1 %590 }
  0xfc   :  { %v190_v32 = vunpack.c.l.bf16 %v186_v24  ;;  %v192_v33 = vunpack.c.h.bf16 %v186_v24  ;;  %v388_v34 = vunpack.c.l.bf16 %v384_v25  ;;  %v390_v35 = vunpack.c.h.bf16 %v384_v25 }
  0xfd   :  { %v217_v36 = vmul.f32 %v200_v2, %v189_v28  ;;  %v219_v37 = vmul.f32 %v205_v13, %v191_v29  ;;  %v413_v38 = vmul.f32 %v401_v26, %v389_v31  ;;  %v411_v39 = vmul.f32 %v397_v27, %v387_v30 }
  0xfe   :  { %v218_v40 = vmul.f32 %v200_v2, %v190_v32  ;;  %v220_v41 = vmul.f32 %v205_v13, %v192_v33  ;;  %v414_v42 = vmul.f32 %v401_v26, %v390_v35  ;;  %v412_v43 = vmul.f32 %v397_v27, %v388_v34  ;;  %v176_v44 = vpop.f32.mrb[4].mxu0  ;;  %v374_v45 = vpop.f32.mrb[4].mxu1 }
  0xff   :  { %v1359_v46 = vadd.f32 %v413_v38, %v219_v37  ;;  %v1361_v47 = vadd.f32 %v411_v39, %v217_v36  ;;  %v178_v48 = vpop.f32.mrb[5].mxu0  ;;  %v376_v49 = vpop.f32.mrb[5].mxu1 }
 0x100   :  { %v1363_v50 = vadd.f32 %v414_v42, %v220_v41  ;;  %v1365_v51 = vadd.f32 %v412_v43, %v218_v40  ;;  %v180_v52 = vpop.f32.mrb[6].mxu0  ;;  %v378_v53 = vpop.f32.mrb[6].mxu1 }
 0x101   :  { %v187_v54 = vpack.c.bf16 %v180_v52, %v176_v44  ;;  %v385_v55 = vpack.c.bf16 %v378_v53, %v374_v45  ;;  %v182_v56 = vpop.f32.mrb[7].mxu0  ;;  %v380_v57 = vpop.f32.mrb[7].mxu1 }
 0x102   :  { %v188_v58 = vpack.c.bf16 %v182_v56, %v178_v48  ;;  %v386_v59 = vpack.c.bf16 %v380_v57, %v376_v49  ;;  %v1379_v21 = vpop.permute.xlu1 %598  ;;  %v785_v43 = vpop.permute.xlu0 %784 }
 0x103   :  { %v193_v62 = vunpack.c.l.bf16 %v187_v54  ;;  %v195_v63 = vunpack.c.h.bf16 %v187_v54  ;;  %v391_v0 = vunpack.c.l.bf16 %v385_v55  ;;  %v393_v1 = vunpack.c.h.bf16 %v385_v55 }
 0x104   :  { %v194_v3 = vunpack.c.l.bf16 %v188_v58  ;;  %v196_v4 = vunpack.c.h.bf16 %v188_v58  ;;  %v392_v5 = vunpack.c.l.bf16 %v386_v59  ;;  %v394_v6 = vunpack.c.h.bf16 %v386_v59 }
 0x105   :  { %v221_v7 = vmul.f32 %v1355_v11, %v193_v62  ;;  %v223_v8 = vmul.f32 %v1357_v12, %v195_v63  ;;  %v415_v9 = vmul.f32 %v405_v60, %v391_v0  ;;  %v417_v10 = vmul.f32 %v409_v61, %v393_v1 }
 0x106   :  { %v222_v2 = vmul.f32 %v1355_v11, %v194_v3  ;;  %v224_v13 = vmul.f32 %v1357_v12, %v196_v4  ;;  %v416_v14 = vmul.f32 %v405_v60, %v392_v5  ;;  %v418_v15 = vmul.f32 %v409_v61, %v394_v6  ;;  %v1381_v22 = vpop.permute.xlu1 %602 }
 0x107   :  { %v1371_v16 = vadd.f32 %v415_v9, %v221_v7  ;;  %v1373_v17 = vadd.f32 %v417_v10, %v223_v8 }
 0x108   :  { %v1375_v18 = vadd.f32 %v416_v14, %v222_v2  ;;  %v1377_v19 = vadd.f32 %v418_v15, %v224_v13 }
 0x10a   :  { %v789_v42 = vpop.permute.xlu1 %788 }
 0x116   :  { %v558_v24 = vpop.f32.mrb[8].mxu0  ;;  %v752_v11 = vpop.f32.mrb[8].mxu1 }
 0x117   :  { %v560_v25 = vpop.f32.mrb[9].mxu0  ;;  %v754_v12 = vpop.f32.mrb[9].mxu1 }
 0x118   :  { %v562_v26 = vpop.f32.mrb[10].mxu0  ;;  %v756_v27 = vpop.f32.mrb[10].mxu1 }
 0x119   :  { %v577_v28 = vpack.c.bf16 %v562_v26, %v558_v24  ;;  %v771_v29 = vpack.c.bf16 %v756_v27, %v752_v11  ;;  %v564_v30 = vpop.f32.mrb[11].mxu0  ;;  %v758_v31 = vpop.f32.mrb[11].mxu1 }
 0x11a   :  { %v578_v32 = vpack.c.bf16 %v564_v30, %v560_v25  ;;  %v772_v33 = vpack.c.bf16 %v758_v31, %v754_v12  ;;  %v797_v24 = vpop.permute.xlu0 %796 }
 0x11b   :  { %v581_v34 = vunpack.c.l.bf16 %v577_v28  ;;  %v583_v35 = vunpack.c.h.bf16 %v577_v28  ;;  %v775_v36 = vunpack.c.l.bf16 %v771_v29  ;;  %v777_v37 = vunpack.c.h.bf16 %v771_v29 }
 0x11c   :  { %v582_v38 = vunpack.c.l.bf16 %v578_v32  ;;  %v584_v39 = vunpack.c.h.bf16 %v578_v32  ;;  %v776_v40 = vunpack.c.l.bf16 %v772_v33  ;;  %v778_v41 = vunpack.c.h.bf16 %v772_v33 }
 0x11d   :  { %v605_v44 = vmul.f32 %v591_v20, %v581_v34  ;;  %v607_v45 = vmul.f32 %v595_v23, %v583_v35  ;;  %v801_v55 = vmul.f32 %v789_v42, %v777_v37  ;;  %v799_v57 = vmul.f32 %v785_v43, %v775_v36 }
 0x11e   :  { %v606_v48 = vmul.f32 %v591_v20, %v582_v38  ;;  %v608_v49 = vmul.f32 %v595_v23, %v584_v39  ;;  %v568_v52 = vpop.f32.mrb[12].mxu0  ;;  %v762_v53 = vpop.f32.mrb[12].mxu1  ;;  %v802_v61 = vmul.f32 %v789_v42, %v778_v41  ;;  %v800_v63 = vmul.f32 %v785_v43, %v776_v40 }
 0x11f   :  { %v615_v54 = vadd.f32 %v607_v45, %v1359_v46  ;;  %v613_v56 = vadd.f32 %v605_v44, %v1361_v47  ;;  %v570_v58 = vpop.f32.mrb[13].mxu0  ;;  %v764_v59 = vpop.f32.mrb[13].mxu1 }
 0x120   :  { %v616_v60 = vadd.f32 %v608_v49, %v1363_v50  ;;  %v614_v62 = vadd.f32 %v606_v48, %v1365_v51  ;;  %v572_v0 = vpop.f32.mrb[14].mxu0  ;;  %v766_v1 = vpop.f32.mrb[14].mxu1 }
 0x121   :  { %v809_v3 = vadd.f32 %v801_v55, %v615_v54  ;;  %v807_v4 = vadd.f32 %v799_v57, %v613_v56  ;;  %v579_v5 = vpack.c.bf16 %v572_v0, %v568_v52  ;;  %v773_v6 = vpack.c.bf16 %v766_v1, %v762_v53  ;;  %v574_v7 = vpop.f32.mrb[15].mxu0  ;;  %v768_v46 = vpop.f32.mrb[15].mxu1 }
 0x122   :  { %v810_v8 = vadd.f32 %v802_v61, %v616_v60  ;;  %v808_v9 = vadd.f32 %v800_v63, %v614_v62  ;;  %v580_v47 = vpack.c.bf16 %v574_v7, %v570_v58  ;;  %v774_v10 = vpack.c.bf16 %v768_v46, %v764_v59  ;;  %v793_v20 = vpop.permute.xlu1 %792 }
 0x123   :  { %817 = vst [vmem:[#allocation2 + $0x10] sm:$0xff] %v809_v3  ;;  %815 = vst [vmem:[#allocation2] sm:$0xff] %v807_v4  ;;  %v585_v2 = vunpack.c.l.bf16 %v579_v5  ;;  %v587_v50 = vunpack.c.h.bf16 %v579_v5  ;;  %v779_v13 = vunpack.c.l.bf16 %v773_v6  ;;  %v781_v14 = vunpack.c.h.bf16 %v773_v6 }
 0x124   :  { %818 = vst [vmem:[#allocation2 + $0x18] sm:$0xff] %v810_v8  ;;  %816 = vst [vmem:[#allocation2 + $0x8] sm:$0xff] %v808_v9  ;;  %v586_v51 = vunpack.c.l.bf16 %v580_v47  ;;  %v588_v15 = vunpack.c.h.bf16 %v580_v47  ;;  %v780_v23 = vunpack.c.l.bf16 %v774_v10  ;;  %v782_v11 = vunpack.c.h.bf16 %v774_v10 }
 0x125   :  { %v609_v25 = vmul.f32 %v1379_v21, %v585_v2  ;;  %v611_v12 = vmul.f32 %v1381_v22, %v587_v50  ;;  %v803_v29 = vmul.f32 %v793_v20, %v779_v13  ;;  %v805_v31 = vmul.f32 %v797_v24, %v781_v14 }
 0x126   :  { %v610_v26 = vmul.f32 %v1379_v21, %v586_v51  ;;  %v612_v27 = vmul.f32 %v1381_v22, %v588_v15  ;;  %v804_v33 = vmul.f32 %v793_v20, %v780_v23  ;;  %v806_v35 = vmul.f32 %v797_v24, %v782_v11 }
 0x127   :  { %v617_v28 = vadd.f32 %v609_v25, %v1371_v16  ;;  %v619_v30 = vadd.f32 %v611_v12, %v1373_v17 }
 0x128   :  { %v618_v32 = vadd.f32 %v610_v26, %v1375_v18  ;;  %v620_v34 = vadd.f32 %v612_v27, %v1377_v19 }
 0x129   :  { %v811_v36 = vadd.f32 %v803_v29, %v617_v28  ;;  %v813_v37 = vadd.f32 %v805_v31, %v619_v30 }
 0x12a   :  { %v812_v21 = vadd.f32 %v804_v33, %v618_v32  ;;  %v814_v38 = vadd.f32 %v806_v35, %v620_v34 }
 0x12b   :  { %819 = vst [vmem:[#allocation2 + $0x20] sm:$0xff] %v811_v36  ;;  %821 = vst [vmem:[#allocation2 + $0x30] sm:$0xff] %v813_v37 }
 0x12c   :  { %820 = vst [vmem:[#allocation2 + $0x28] sm:$0xff] %v812_v21  ;;  %822 = vst [vmem:[#allocation2 + $0x38] sm:$0xff] %v814_v38 }
 0x12d   :  { %1077 = shalt.err (!%p1074_p4)
}
 0x12e   :  { %s1078_s18 = scalar_lea.hbm %s1410_s3, 1024 }
 0x12f   :  { %p1079_p5 = scmp.ne.s32.totalorder %s1410_s3, %s1078_s18  ;;  %p1082_p6 = scmp.lt.u32.totalorder %s1078_s18, %s1410_s3 }
 0x131   :  { %p1084_p7 = pnand %p1082_p6, %p1079_p5 }
 0x133   :  { %1087 = shalt.err (!%p1084_p7)
}
 0x134   :  { %s1095_s23 = smov 256   ;;  %s1096_s24 = smov 16  }
 0x135   :  { %834 = dma.vmem_to_hbm [thread:$0]  %s829_s14, 1024, %s1410_s3, [#allocation3], %s1095_s23, %s1095_s23, %s1096_s24  }
 0x136   :  { %1088 = dma.done.wait [#allocation3], 1024  }
 0x137   :  { %1089 = vsyncadd [#allocation3], 4294966272 }
 0x138   :  { %838 = vsyncpa [#allocation3], 1 }

</bundles_post_ra>
